<compile_context>
chip_gen: v7x
topology: tpu7x:2x2x1
jax: 0.10.0
libtpu: 0.0.40
codegen_flags: <defaults>
</compile_context>

<pallas_src>
import jax
import jax.numpy as jnp
from jax.experimental import pallas as pl
from jax.experimental.pallas import tpu as pltpu


def _mlp_kernel(x_ref, w1_ref, w2_ref, w3_ref, w4_ref, b_ref, o_ref):
    # x_ref: (tile, PACK*n_in) f32 -- PACK batch rows packed per sublane-row.
    # w*_ref: block-diagonal bf16 weights (resident in VMEM).
    # b_ref: (4, d1) f32 -- stacked, PACK-tiled biases (row i = layer i+1).
    d1 = w1_ref.shape[1]
    d2 = w2_ref.shape[1]
    d3 = w3_ref.shape[1]
    d4 = w4_ref.shape[1]

    # In-kernel f32 -> bf16 cast (saves a separate wrapper-side HBM pass).
    x = x_ref[...].astype(jnp.bfloat16)

    h1 = jnp.dot(x, w1_ref[...], preferred_element_type=jnp.float32)
    h1 = jnp.maximum(h1 + b_ref[0:1, 0:d1], 0.0)

    h2 = jnp.dot(h1.astype(jnp.bfloat16), w2_ref[...],
                 preferred_element_type=jnp.float32)
    h2 = jnp.maximum(h2 + b_ref[1:2, 0:d2], 0.0)

    h3 = jnp.dot(h2.astype(jnp.bfloat16), w3_ref[...],
                 preferred_element_type=jnp.float32)
    h3 = jnp.maximum(h3 + b_ref[2:3, 0:d3], 0.0)

    h4 = jnp.dot(h3.astype(jnp.bfloat16), w4_ref[...],
                 preferred_element_type=jnp.float32)
    o_ref[...] = (h4 + b_ref[3:4, 0:d4]).astype(o_ref.dtype)


def _round_up(v, m):
    return ((v + m - 1) // m) * m


def net_forward(x, params, *, tile_rows=1024):
    """x: (B, n_in) float32; params: w_i (in,out), b_i (1,out) as in init_params."""
    B, n_in = x.shape

    # How many batch rows fit across the 128-lane vreg width.
    pack = 128 // n_in if (n_in <= 128 and 128 % n_in == 0) else 1

    padded_b = _round_up(B, pack)
    if padded_b != B:
        # Only when B is not a multiple of `pack`; otherwise the packed view
        # below is a free row-major bitcast (no extra HBM pass over x).
        x = jnp.pad(x, ((0, padded_b - B), (0, 0)))
    n_rows = padded_b // pack
    x_packed = x.reshape(n_rows, pack * n_in)

    # Block-diagonal weight replicas + PACK-tiled biases.  <200 KiB total;
    # hoist to parameter-prep time in production.
    eye = jnp.eye(pack, dtype=jnp.float32)
    w1 = jnp.kron(eye, params["w1"]).astype(jnp.bfloat16)
    w2 = jnp.kron(eye, params["w2"]).astype(jnp.bfloat16)
    w3 = jnp.kron(eye, params["w3"]).astype(jnp.bfloat16)
    w4 = jnp.kron(eye, params["w4"]).astype(jnp.bfloat16)
    d1 = w1.shape[1]
    biases = [jnp.tile(params[f"b{i}"], (1, pack)) for i in (1, 2, 3, 4)]
    b_stack = jnp.concatenate(
        [jnp.pad(b, ((0, 0), (0, d1 - b.shape[1]))) for b in biases], axis=0)

    # Batch-tile selection (in packed rows per grid step).
    max_tile = _round_up(max(8, tile_rows), 8)
    min_split = 256  # below this, a second grid step is pure overhead
    if n_rows > max_tile:
        eff = max_tile                              # multiple of 8; >=2 steps
    elif n_rows >= 2 * min_split:
        eff = _round_up(pl.cdiv(n_rows, 2), 8)      # >=2 steps for v7x's 2 TCs
    else:
        eff = n_rows                                # single full-array block
    grid = (pl.cdiv(n_rows, eff),)                  # ragged tail -> masked store

    def resident(arr):
        # Same block every grid step -> stays in VMEM for the whole grid.
        return pl.BlockSpec(arr.shape, lambda i: (0,) * arr.ndim)

    weights = (w1, w2, w3, w4, b_stack)
    in_specs = [pl.BlockSpec((eff, pack * n_in), lambda i: (i, 0))] + \
               [resident(a) for a in weights]
    out_spec = pl.BlockSpec((eff, pack), lambda i: (i, 0))

    out = pl.pallas_call(
        _mlp_kernel,
        out_shape=jax.ShapeDtypeStruct((n_rows, pack), jnp.float32),
        grid_spec=pltpu.PrefetchScalarGridSpec(
            num_scalar_prefetch=0,
            grid=grid,
            in_specs=in_specs,
            out_specs=out_spec,
        ),
        compiler_params=pltpu.CompilerParams(
            dimension_semantics=("parallel",),
            vmem_limit_bytes=32 * 1024 * 1024,
        ),
    )(x_packed, *weights)

    # Un-pack: (n_rows, pack) row-major == (padded_b, 1); drop pad rows.
    return out.reshape(padded_b, 1)[:B]


def init_params(key, n_inputs=32):
    """Deterministic init matching the PyTorch layer shapes.

    PyTorch nn.Linear(in, out) stores weight (out, in); we store the transpose
    (in, out) so the kernel computes x @ W + b directly.
    """
    dims = [
        (n_inputs, n_inputs * 2),   # fc1
        (n_inputs * 2, n_inputs),   # fc2
        (n_inputs, n_inputs // 2),  # fc3
        (n_inputs // 2, 1),         # fc4
    ]
    params = {}
    for i, (d_in, d_out) in enumerate(dims, start=1):
        key, kw, kb = jax.random.split(key, 3)
        bound = 1.0 / (d_in ** 0.5)  # same scale as PyTorch default uniform init
        params[f"w{i}"] = jax.random.uniform(
            kw, (d_in, d_out), jnp.float32, minval=-bound, maxval=bound)
        params[f"b{i}"] = jax.random.uniform(
            kb, (1, d_out), jnp.float32, minval=-bound, maxval=bound)
    return params


def net_forward_ref(x, params):
    """Plain-JAX f32 reference for sanity checking."""
    h = jnp.maximum(x @ params["w1"] + params["b1"], 0.0)
    h = jnp.maximum(h @ params["w2"] + params["b2"], 0.0)
    h = jnp.maximum(h @ params["w3"] + params["b3"], 0.0)
    return h @ params["w4"] + params["b4"]


if __name__ == "__main__":
    n_inputs = 32

    key = jax.random.PRNGKey(0)
    key, kx1, kx2, kx3 = jax.random.split(key, 4)
    params = init_params(key, n_inputs)

    # Small batch: single grid step, pack-aligned (8 rows -> 2 packed rows).
    x_small = jax.random.normal(kx1, (8, n_inputs), jnp.float32)
    out_small = jax.block_until_ready(net_forward(x_small, params))
    ref_small = net_forward_ref(x_small, params)
    assert out_small.shape == (8, 1)
    assert jnp.allclose(out_small, ref_small, atol=5e-2, rtol=5e-2)

    # Multi-step grid with a ragged last block (50 packed rows, 16-row tiles).
    x_big = jax.random.normal(kx2, (200, n_inputs), jnp.float32)
    out_big = jax.block_until_ready(net_forward(x_big, params, tile_rows=16))
    ref_big = net_forward_ref(x_big, params)
    assert out_big.shape == (200, 1)
    assert jnp.allclose(out_big, ref_big, atol=5e-2, rtol=5e-2)

    # Batch not a multiple of the pack factor (exercises the pad path).
    x_odd = jax.random.normal(kx3, (203, n_inputs), jnp.float32)
    out_odd = jax.block_until_ready(net_forward(x_odd, params))
    ref_odd = net_forward_ref(x_odd, params)
    assert out_odd.shape == (203, 1)
    assert jnp.allclose(out_odd, ref_odd, atol=5e-2, rtol=5e-2)

    print("KERNEL_OK")
</pallas_src>

<mosaic_0001>
module attributes {stable_mosaic.version = 11 : i64} {
  func.func @_mlp_kernel(%arg0: i32, %arg1: memref<2x128xf32, #tpu.memory_space<vmem>>, %arg2: memref<128x256xbf16, #tpu.memory_space<vmem>>, %arg3: memref<256x128xbf16, #tpu.memory_space<vmem>>, %arg4: memref<128x64xbf16, #tpu.memory_space<vmem>>, %arg5: memref<64x4xbf16, #tpu.memory_space<vmem>>, %arg6: memref<4x256xf32, #tpu.memory_space<vmem>>, %arg7: memref<2x4xf32, #tpu.memory_space<vmem>>) attributes {dimension_semantics = [#tpu.dimension_semantics<parallel>], iteration_bounds = array<i64: 1>, scalar_prefetch = 0 : i64, scratch_operands = 0 : i64, tpu.core_type = #tpu.core_type<tc>, window_params = [{transform_indices = @transform_0, window_bounds = array<i64: 2, 128>}, {pipeline_mode = #tpu.pipeline_mode<synchronous>, transform_indices = @transform_1, window_bounds = array<i64: 128, 256>}, {pipeline_mode = #tpu.pipeline_mode<synchronous>, transform_indices = @transform_2, window_bounds = array<i64: 256, 128>}, {pipeline_mode = #tpu.pipeline_mode<synchronous>, transform_indices = @transform_3, window_bounds = array<i64: 128, 64>}, {pipeline_mode = #tpu.pipeline_mode<synchronous>, transform_indices = @transform_4, window_bounds = array<i64: 64, 4>}, {pipeline_mode = #tpu.pipeline_mode<synchronous>, transform_indices = @transform_5, window_bounds = array<i64: 4, 256>}, {transform_indices = @transform_6, window_bounds = array<i64: 2, 4>}]} {
    %c0 = arith.constant 0 : index
    %c0_0 = arith.constant 0 : index
    %0 = vector.load %arg1[%c0, %c0_0] : memref<2x128xf32, #tpu.memory_space<vmem>>, vector<2x128xf32>
    %1 = arith.truncf %0 : vector<2x128xf32> to vector<2x128xbf16>
    %c0_1 = arith.constant 0 : index
    %c0_2 = arith.constant 0 : index
    %2 = vector.load %arg2[%c0_1, %c0_2] : memref<128x256xbf16, #tpu.memory_space<vmem>>, vector<128x256xbf16>
    %cst = arith.constant dense<0.000000e+00> : vector<2x256xf32>
    %3 = tpu.matmul %1, %2, %cst {dimension_numbers = #tpu.dot_dimension_numbers<[1], [0], [0], [1], [0, 0, 1, 1], [], []>} : vector<2x128xbf16>, vector<128x256xbf16>, vector<2x256xf32> -> vector<2x256xf32>
    %c0_3 = arith.constant 0 : index
    %c0_4 = arith.constant 0 : index
    %4 = vector.load %arg6[%c0_3, %c0_4] : memref<4x256xf32, #tpu.memory_space<vmem>>, vector<1x256xf32>
    %5 = vector.broadcast %4 : vector<1x256xf32> to vector<2x256xf32>
    %6 = arith.addf %3, %5 : vector<2x256xf32>
    %cst_5 = arith.constant 0.000000e+00 : f32
    %7 = vector.broadcast %cst_5 : f32 to vector<2x256xf32>
    %8 = arith.maximumf %6, %7 : vector<2x256xf32>
    %9 = arith.truncf %8 : vector<2x256xf32> to vector<2x256xbf16>
    %c0_6 = arith.constant 0 : index
    %c0_7 = arith.constant 0 : index
    %10 = vector.load %arg3[%c0_6, %c0_7] : memref<256x128xbf16, #tpu.memory_space<vmem>>, vector<256x128xbf16>
    %cst_8 = arith.constant dense<0.000000e+00> : vector<2x128xf32>
    %11 = tpu.matmul %9, %10, %cst_8 {dimension_numbers = #tpu.dot_dimension_numbers<[1], [0], [0], [1], [0, 0, 1, 1], [], []>} : vector<2x256xbf16>, vector<256x128xbf16>, vector<2x128xf32> -> vector<2x128xf32>
    %c1 = arith.constant 1 : index
    %c0_9 = arith.constant 0 : index
    %12 = vector.load %arg6[%c1, %c0_9] : memref<4x256xf32, #tpu.memory_space<vmem>>, vector<1x128xf32>
    %13 = vector.broadcast %12 : vector<1x128xf32> to vector<2x128xf32>
    %14 = arith.addf %11, %13 : vector<2x128xf32>
    %cst_10 = arith.constant 0.000000e+00 : f32
    %15 = vector.broadcast %cst_10 : f32 to vector<2x128xf32>
    %16 = arith.maximumf %14, %15 : vector<2x128xf32>
    %17 = arith.truncf %16 : vector<2x128xf32> to vector<2x128xbf16>
    %c0_11 = arith.constant 0 : index
    %c0_12 = arith.constant 0 : index
    %18 = vector.load %arg4[%c0_11, %c0_12] : memref<128x64xbf16, #tpu.memory_space<vmem>>, vector<128x64xbf16>
    %cst_13 = arith.constant dense<0.000000e+00> : vector<2x64xf32>
    %19 = tpu.matmul %17, %18, %cst_13 {dimension_numbers = #tpu.dot_dimension_numbers<[1], [0], [0], [1], [0, 0, 1, 1], [], []>} : vector<2x128xbf16>, vector<128x64xbf16>, vector<2x64xf32> -> vector<2x64xf32>
    %c2 = arith.constant 2 : index
    %c0_14 = arith.constant 0 : index
    %20 = vector.load %arg6[%c2, %c0_14] : memref<4x256xf32, #tpu.memory_space<vmem>>, vector<1x64xf32>
    %21 = vector.broadcast %20 : vector<1x64xf32> to vector<2x64xf32>
    %22 = arith.addf %19, %21 : vector<2x64xf32>
    %cst_15 = arith.constant 0.000000e+00 : f32
    %23 = vector.broadcast %cst_15 : f32 to vector<2x64xf32>
    %24 = arith.maximumf %22, %23 : vector<2x64xf32>
    %25 = arith.truncf %24 : vector<2x64xf32> to vector<2x64xbf16>
    %c0_16 = arith.constant 0 : index
    %c0_17 = arith.constant 0 : index
    %26 = vector.load %arg5[%c0_16, %c0_17] : memref<64x4xbf16, #tpu.memory_space<vmem>>, vector<64x4xbf16>
    %cst_18 = arith.constant dense<0.000000e+00> : vector<2x4xf32>
    %27 = tpu.matmul %25, %26, %cst_18 {dimension_numbers = #tpu.dot_dimension_numbers<[1], [0], [0], [1], [0, 0, 1, 1], [], []>} : vector<2x64xbf16>, vector<64x4xbf16>, vector<2x4xf32> -> vector<2x4xf32>
    %c3 = arith.constant 3 : index
    %c0_19 = arith.constant 0 : index
    %28 = vector.load %arg6[%c3, %c0_19] : memref<4x256xf32, #tpu.memory_space<vmem>>, vector<1x4xf32>
    %29 = vector.broadcast %28 : vector<1x4xf32> to vector<2x4xf32>
    %30 = arith.addf %27, %29 : vector<2x4xf32>
    %c0_20 = arith.constant 0 : index
    %c0_21 = arith.constant 0 : index
    %31 = vector.load %arg7[%c0_20, %c0_21] : memref<2x4xf32, #tpu.memory_space<vmem>>, vector<2x4xf32>
    tpu.vector_store %arg7[%c0_20, %c0_21], %30 {strides = array<i32>} : memref<2x4xf32, #tpu.memory_space<vmem>>, vector<2x4xf32>,
    return
  }
  func.func @transform_0(%arg0: i32) -> (i32, i32) {
    %c0_i32 = arith.constant 0 : i32
    %c0_i32_0 = arith.constant 0 : i32
    return %arg0, %c0_i32 : i32, i32
  }
  func.func @transform_1(%arg0: i32) -> (i32, i32) {
    %c0_i32 = arith.constant 0 : i32
    %c0_i32_0 = arith.constant 0 : i32
    %c0_i32_1 = arith.constant 0 : i32
    return %c0_i32, %c0_i32_0 : i32, i32
  }
  func.func @transform_2(%arg0: i32) -> (i32, i32) {
    %c0_i32 = arith.constant 0 : i32
    %c0_i32_0 = arith.constant 0 : i32
    %c0_i32_1 = arith.constant 0 : i32
    return %c0_i32, %c0_i32_0 : i32, i32
  }
  func.func @transform_3(%arg0: i32) -> (i32, i32) {
    %c0_i32 = arith.constant 0 : i32
    %c0_i32_0 = arith.constant 0 : i32
    %c0_i32_1 = arith.constant 0 : i32
    return %c0_i32, %c0_i32_0 : i32, i32
  }
  func.func @transform_4(%arg0: i32) -> (i32, i32) {
    %c0_i32 = arith.constant 0 : i32
    %c0_i32_0 = arith.constant 0 : i32
    %c0_i32_1 = arith.constant 0 : i32
    return %c0_i32, %c0_i32_0 : i32, i32
  }
  func.func @transform_5(%arg0: i32) -> (i32, i32) {
    %c0_i32 = arith.constant 0 : i32
    %c0_i32_0 = arith.constant 0 : i32
    %c0_i32_1 = arith.constant 0 : i32
    return %c0_i32, %c0_i32_0 : i32, i32
  }
  func.func @transform_6(%arg0: i32) -> (i32, i32) {
    %c0_i32 = arith.constant 0 : i32
    %c0_i32_0 = arith.constant 0 : i32
    return %arg0, %c0_i32 : i32, i32
  }
}

</mosaic_0001>

<bundles_post_ra>
// kernel: tpu_custom_call.1
= control target key start
LH: loop header
LB: loop body
LE: loop exit
PB: predicated region body
PF: predicated region fallthrough
CT: control target
= control target key end

     0   :  { %11 = vsyncpa [#allocation3], 0  ;;  %s1035_s0 = inlined_call_operand.hbm [shape: f32[2,128], index: 0, kind: input, shape index: {}]   ;;  %s1036_s1 = inlined_call_operand.vmem [shape: bf16[128,256], index: 1, kind: input, shape index: {}]   ;;  %s1037_s2 = inlined_call_operand.hbm [shape: bf16[256,128], index: 2, kind: input, shape index: {}]   ;;  %s1038_s3 = inlined_call_operand.vmem [shape: bf16[128,64], index: 3, kind: input, shape index: {}]   ;;  %s1039_s4 = inlined_call_operand.vmem [shape: bf16[64,4], index: 4, kind: input, shape index: {}]   ;;  %s1040_s5 = inlined_call_operand.vmem [shape: f32[4,256], index: 5, kind: input, shape index: {}]   ;;  %s1041_s6 = inlined_call_operand.hbm [shape: f32[2,4], index: 6, kind: output, shape index: {}]  }
   0x1   :  { %12 = vsyncpa [#allocation6], 0 }
   0x2   :  { %13 = vsyncpa [#allocation4], 0  ;;  %s839_s21 = smov [#allocation2]   ;;  %s840_s23 = smov [#allocation5]  }
   0x3   :  { %s20_s22 = sshll.u32 %s839_s21, 4  ;;  %s31_s24 = sshll.u32 %s840_s23, 4  ;;  %s21_s22 = int_to_ptr.vmem [resolvable:$true] %s20_s22  ;;  %s882_s24 = int_to_ptr.vmem [resolvable:$true] %s31_s24 }
   0x4   :  { %s767_s27 = scalar_lea.hbm %s1035_s0, 32 }
   0x5   :  { %p768_p0 = scmp.ne.s32.totalorder %s1035_s0, %s767_s27  ;;  %p771_p1 = scmp.lt.u32.totalorder %s767_s27, %s1035_s0 }
   0x7   :  { %p773_p2 = pnand %p771_p1, %p768_p0 }
   0x9   :  { %776 = shalt.err (!%p773_p2)
}
   0xa   :  { %s777_s8 = scalar_lea.vmem %s21_s22, 32  ;;  %p782_p4 = scmp.lt.s32.totalorder %s21_s22, %s21_s22 }
   0xb   :  { %p778_p3 = scmp.ne.s32.totalorder %s21_s22, %s777_s8  ;;  %p783_p5 = scmp.lt.s32.totalorder %s777_s8, %s777_s8 }
   0xd   :  { %p784_p6 = por %p783_p5, %p782_p4 }
   0xf   :  { %p785_p7 = pnand %p784_p6, %p778_p3 }
  0x11   :  { %788 = shalt.err (!%p785_p7)
}
  0x12   :  { %23 = dma.hbm_to_vmem [thread:$0]  %s1035_s0, 32, %s21_s22, [#allocation3]  }
  0x13   :  { %s789_s13 = scalar_lea.hbm %s1037_s2, 2048 }
  0x14   :  { %p790_p8 = scmp.ne.s32.totalorder %s1037_s2, %s789_s13  ;;  %p793_p9 = scmp.lt.u32.totalorder %s789_s13, %s1037_s2 }
  0x16   :  { %p795_p10 = pnand %p793_p9, %p790_p8 }
  0x18   :  { %798 = shalt.err (!%p795_p10)
}
  0x19   :  { %s799_s18 = scalar_lea.vmem %s882_s24, 2048  ;;  %p804_p12 = scmp.lt.s32.totalorder %s882_s24, %s882_s24 }
  0x1a   :  { %p800_p11 = scmp.ne.s32.totalorder %s882_s24, %s799_s18  ;;  %p805_p13 = scmp.lt.s32.totalorder %s799_s18, %s799_s18 }
  0x1c   :  { %p806_p0 = por %p805_p13, %p804_p12 }
  0x1e   :  { %p807_p1 = pnand %p806_p0, %p800_p11 }
  0x20   :  { %810 = shalt.err (!%p807_p1)
}
  0x21   :  { %s841_s0 = smov 64   ;;  %s842_s19 = smov 4  }
  0x22   :  { %37 = dma.hbm_to_vmem [thread:$0]  %s1037_s2, 2048, %s882_s24, [#allocation6], %s841_s0, %s841_s0, %s842_s19  }
  0x23   :  { %833 = dma.done.wait [#allocation3], 32  }
  0x24   :  { %834 = vsyncadd [#allocation3], 4294967264 }
  0x25   :  { %835 = dma.done.wait [#allocation6], 2048  }
  0x26   :  { %836 = vsyncadd [#allocation6], 4294965248  ;;  %v843_v0 = vmov 0   ;;  %v715_v1 = vld [vmem:[%s1036_s1 + $0x4] ss:$8 sps:$4 sm:$0xff]   ;;  %v743_v15 = vld [vmem:[#allocation5 + $0x50] sm:$0xff]   ;;  %v71_v42 = vlaneseq }
  0x27   :  { %193 = vmatprep.mubr.bf16.mxu0 %v843_v0  ;;  %v717_v2 = vld [vmem:[%s1036_s1] ss:$8 sps:$4 sm:$0xff]   ;;  %161 = vmatprep.subr.bf16.mxu0 %v715_v1  ;;  %v718_v3 = vld [vmem:[%s1036_s1 + $0x14] ss:$8 sps:$4 sm:$0xff]   ;;  %v720_v4 = vld [vmem:[%s1036_s1 + $0x10] ss:$8 sps:$4 sm:$0xff]  }
  0x28   :  { %162 = vmatpush1.bf16.msra.mxu0 %v717_v2  ;;  %v721_v5 = vld [vmem:[%s1036_s1 + $0x24] ss:$8 sps:$4 sm:$0xff]   ;;  %v723_v6 = vld [vmem:[%s1036_s1 + $0x20] ss:$8 sps:$4 sm:$0xff]   ;;  %v724_v7 = vld [vmem:[%s1036_s1 + $0x34] ss:$8 sps:$4 sm:$0xff]  }
  0x29   :  { %163 = vmatprep.subr.bf16.mxu0 %v718_v3  ;;  %v726_v8 = vld [vmem:[%s1036_s1 + $0x30] ss:$8 sps:$4 sm:$0xff]   ;;  %v727_v9 = vld [vmem:[%s1036_s1 + $0x44] ss:$8 sps:$4 sm:$0xff]   ;;  %v729_v12 = vld [vmem:[%s1036_s1 + $0x40] ss:$8 sps:$4 sm:$0xff]  }
  0x2a   :  { %v739_v10 = vld [vmem:[#allocation5 + $0x40] sm:$0xff]   ;;  %v741_v13 = vld [vmem:[#allocation5 + $0x48] sm:$0xff]   ;;  %v730_v16 = vld [vmem:[%s1036_s1 + $0x54] ss:$8 sps:$4 sm:$0xff]   ;;  %v844_v36 = vmov 0.0   ;;  %v72_v43 = vshrl.u32 %v71_v42, 7 }
  0x2b   :  { %v740_v11 = vld [vmem:[#allocation5] sm:$0xff]   ;;  %639 = vmatprep.subr.bf16.mxu1 %v739_v10  ;;  %v742_v14 = vld [vmem:[#allocation5 + $0x8] sm:$0xff]   ;;  %v744_v18 = vld [vmem:[#allocation5 + $0x10] sm:$0xff]   ;;  %vm845_vm0 = vmmov 0   ;;  %vm529_vm1 = vcmask 523264   ;;  %s846_s30 = smov [#allocation7]  }
  0x2c   :  { %164 = vmatpush1.bf16.msra.mxu0 %v720_v4  ;;  %640 = vmatpush3.bf16.msra.mxu1 %v740_v11  ;;  %v732_v17 = vld [vmem:[%s1036_s1 + $0x50] ss:$8 sps:$4 sm:$0xff]   ;;  %v733_v20 = vld [vmem:[%s1036_s1 + $0x64] ss:$8 sps:$4 sm:$0xff]   ;;  %v735_v21 = vld [vmem:[%s1036_s1 + $0x60] ss:$8 sps:$4 sm:$0xff]  }
  0x2d   :  { %165 = vmatprep.subr.bf16.mxu0 %v721_v5  ;;  %641 = vmatprep.subr.bf16.mxu1 %v741_v13  ;;  %v745_v19 = vld [vmem:[#allocation5 + $0x58] sm:$0xff]   ;;  %v747_v24 = vld [vmem:[#allocation5 + $0x60] sm:$0xff]   ;;  %v749_v28 = vld [vmem:[#allocation5 + $0x68] sm:$0xff]   ;;  %v73_v44 = vsub.s32 0, %v72_v43  ;;  %v77_v46 = vsub.s32 1, %v72_v43  ;;  %vm573_vm2 = vcmask 25600  }
  0x2e   :  { %v746_v22 = vld [vmem:[#allocation5 + $0x18] sm:$0xff]   ;;  %v748_v25 = vld [vmem:[#allocation5 + $0x20] sm:$0xff]   ;;  %v750_v29 = vld [vmem:[#allocation5 + $0x28] sm:$0xff]  }
  0x2f   :  { %v736_v23 = vld [vmem:[%s1036_s1 + $0x74] ss:$8 sps:$4 sm:$0xff]   ;;  %v738_v26 = vld [vmem:[%s1036_s1 + $0x70] ss:$8 sps:$4 sm:$0xff]   ;;  %v51_v27 = vld [vmem:[#allocation2] sm:$0x3] }
  0x30   :  { %166 = vmatpush1.bf16.msra.mxu0 %v723_v6  ;;  %642 = vmatpush3.bf16.msra.mxu1 %v742_v14  ;;  %v52_v30 = vpack.c.bf16 %v51_v27, %v51_v27  ;;  %v751_v31 = vld [vmem:[#allocation5 + $0x70] sm:$0xff]   ;;  %v753_v33 = vld [vmem:[#allocation5 + $0x78] sm:$0xff]   ;;  %v756_v37 = vld [vmem:[%s1038_s3 + $0x8] sm:$0xff]  }
  0x31   :  { %167 = vmatprep.subr.bf16.mxu0 %v724_v7  ;;  %643 = vmatprep.subr.bf16.mxu1 %v743_v15  ;;  %v752_v32 = vld [vmem:[#allocation5 + $0x30] sm:$0xff]   ;;  %v754_v34 = vld [vmem:[#allocation5 + $0x38] sm:$0xff]   ;;  %v760_v41 = vld [vmem:[%s1038_s3 + $0x28] sm:$0xff]  }
  0x32   :  { %v755_v35 = vld [vmem:[%s1038_s3] sm:$0xff]   ;;  %v757_v38 = vld [vmem:[%s1038_s3 + $0x10] sm:$0xff]   ;;  %v758_v39 = vld [vmem:[%s1038_s3 + $0x18] sm:$0xff]  }
  0x33   :  { %v759_v40 = vld [vmem:[%s1038_s3 + $0x20] sm:$0xff]   ;;  %v761_v59 = vld [vmem:[%s1038_s3 + $0x30] sm:$0xff]   ;;  %v762_v60 = vld [vmem:[%s1038_s3 + $0x38] sm:$0xff]  }
  0x34   :  { %168 = vmatpush1.bf16.msra.mxu0 %v726_v8  ;;  %644 = vmatpush3.bf16.msra.mxu1 %v744_v18  ;;  %v69_v45 = vld [vmem:[%s1040_s5] ss:$4 sm:$0x3]  ;;  %v764_v62 = vld [vmem:[%s1039_s4 + $0x8] sm:$0xff]   ;;  %v607_v0 = vld [vmem:[%s1040_s5 + $0x1] ss:$0 sm:$0xff] }
  0x35   :  { %169 = vmatprep.subr.bf16.mxu0 %v727_v9  ;;  %645 = vmatprep.subr.bf16.mxu1 %v745_v19  ;;  %v74_v47 = vrot.slane %v69_v45, %v73_v44  ;;  %v78_v48 = vrot.slane %v69_v45, %v77_v46  ;;  %v763_v61 = vld [vmem:[%s1039_s4] sm:$0xff]   ;;  %v765_v8 = vld [vmem:[%s1039_s4 + $0x10] sm:$0xff]   ;;  %v766_v9 = vld [vmem:[%s1039_s4 + $0x18] sm:$0xff]   ;;  %s581_s4 = sshll.u32 %s846_s30, 4  ;;  %s582_s4 = int_to_ptr.vmem [resolvable:$true] %s581_s4 }
  0x36   :  { %v624_v10 = vld [vmem:[%s1040_s5 + $0x2] ss:$0 sm:$0xff]  ;;  %v633_v18 = vld [vmem:[%s1040_s5 + $0x3] ss:$0 sm:$0xff]  ;;  %s811_s7 = scalar_lea.vmem %s582_s4, 32  ;;  %p816_p3 = scmp.lt.s32.totalorder %s582_s4, %s582_s4 }
  0x37   :  { %p812_p2 = scmp.ne.s32.totalorder %s582_s4, %s811_s7  ;;  %p817_p4 = scmp.lt.s32.totalorder %s811_s7, %s811_s7 }
  0x38   :  { %170 = vmatpush1.bf16.msra.mxu0 %v729_v12  ;;  %646 = vmatpush3.bf16.msra.mxu1 %v746_v22 }
  0x39   :  { %171 = vmatprep.subr.bf16.mxu0 %v730_v16  ;;  %647 = vmatprep.subr.bf16.mxu1 %v747_v24  ;;  %p818_p5 = por %p817_p4, %p816_p3 }
  0x3b   :  { %p819_p6 = pnand %p818_p5, %p812_p2 }
  0x3c   :  { %172 = vmatpush1.bf16.msra.mxu0 %v732_v17  ;;  %648 = vmatpush3.bf16.msra.mxu1 %v748_v25 }
  0x3d   :  { %173 = vmatprep.subr.bf16.mxu0 %v733_v20  ;;  %649 = vmatprep.subr.bf16.mxu1 %v749_v28 }
  0x40   :  { %174 = vmatpush1.bf16.msra.mxu0 %v735_v21  ;;  %650 = vmatpush3.bf16.msra.mxu1 %v750_v29 }
  0x41   :  { %175 = vmatprep.subr.bf16.mxu0 %v736_v23  ;;  %651 = vmatprep.subr.bf16.mxu1 %v751_v31 }
  0x44   :  { %176 = vmatpush1.bf16.msra.mxu0 %v738_v26  ;;  %652 = vmatpush3.bf16.msra.mxu1 %v752_v32 }
  0x45   :  { %653 = vmatprep.subr.bf16.mxu1 %v753_v33  ;;  %675 = vmatprep.subr.bf16.mxu0 %v844_v36 }
  0x47   :  { %194 = vmatmul.mubr.bf16.vlgmr.msra.gmra.mrb[0].mxu0 %v52_v30 }
  0x48   :  { %654 = vmatpush3.bf16.msra.mxu1 %v754_v34  ;;  %676 = vmatpush3.bf16.msra.mxu0 %v755_v35 }
  0x49   :  { %695 = vmatprep.subr.bf16.mxu1 %v844_v36  ;;  %677 = vmatprep.subr.bf16.mxu0 %v844_v36 }
  0x4a   :  { %691 = vmatprep.mubr.msk.bf16.mxu0 %vm845_vm0, %v844_v36 }
  0x4c   :  { %678 = vmatpush3.bf16.msra.mxu0 %v756_v37 }
  0x4d   :  { %679 = vmatprep.subr.bf16.mxu0 %v844_v36 }
  0x50   :  { %680 = vmatpush3.bf16.msra.mxu0 %v757_v38 }
  0x51   :  { %681 = vmatprep.subr.bf16.mxu0 %v844_v36 }
  0x54   :  { %682 = vmatpush3.bf16.msra.mxu0 %v758_v39 }
  0x55   :  { %683 = vmatprep.subr.bf16.mxu0 %v844_v36 }
  0x58   :  { %684 = vmatpush3.bf16.msra.mxu0 %v759_v40 }
  0x59   :  { %685 = vmatprep.subr.bf16.mxu0 %v844_v36 }
  0x5c   :  { %686 = vmatpush3.bf16.msra.mxu0 %v760_v41 }
  0x5d   :  { %687 = vmatprep.subr.bf16.mxu0 %v844_v36 }
  0x60   :  { %688 = vmatpush3.bf16.msra.mxu0 %v761_v59 }
  0x61   :  { %689 = vmatprep.subr.bf16.mxu0 %v844_v36 }
  0x64   :  { %690 = vmatpush3.bf16.msra.mxu0 %v762_v60 }
 0x11a   :  { %v195_v49 = vpop.f32.mrb[0].mxu0 }
 0x11b   :  { %v196_v50 = vadd.f32 %v195_v49, %v74_v47  ;;  %v197_v51 = vpop.f32.mrb[1].mxu0 }
 0x11c   :  { %v198_v52 = vadd.f32 %v197_v51, %v78_v48  ;;  %v199_v53 = vpop.f32.mrb[2].mxu0 }
 0x11d   :  { %v202_v54 = vmax.f32 %v196_v50, 0.0  ;;  %v200_v55 = vpop.f32.mrb[3].mxu0 }
 0x11e   :  { %v203_v56 = vmax.f32 %v198_v52, 0.0 }
 0x11f   :  { %v204_v58 = vpack.c.bf16 %v202_v54, %v202_v54 }
 0x120   :  { %v205_v57 = vpack.c.bf16 %v203_v56, %v203_v56 }
 0x122   :  { %371 = vmatprep.mubr.bf16.mxu1 %v205_v57 }
 0x123   :  { %372 = vmatmul.mubr.bf16.vlgmr.msra.gmra.mrb[0].mxu1 %v204_v58 }
 0x124   :  { %703 = vmatprep.mubr.msk.bf16.mxu1 %vm845_vm0, %v844_v36  ;;  %696 = vmatpush3.bf16.msra.mxu1 %v763_v61 }
 0x125   :  { %697 = vmatprep.subr.bf16.mxu1 %v844_v36 }
 0x128   :  { %698 = vmatpush3.bf16.msra.mxu1 %v764_v62 }
 0x129   :  { %699 = vmatprep.subr.bf16.mxu1 %v844_v36 }
 0x12c   :  { %700 = vmatpush3.bf16.msra.mxu1 %v765_v8 }
 0x12d   :  { %701 = vmatprep.subr.bf16.mxu1 %v844_v36 }
 0x130   :  { %702 = vmatpush3.bf16.msra.mxu1 %v766_v9 }
 0x1f6   :  { %v655_v63 = vpop.f32.mrb[0].mxu1 }
 0x1f7   :  { %v656_v1 = vpop.f32.mrb[1].mxu1 }
 0x1f8   :  { %v657_v2 = vadd.f32 %v656_v1, %v655_v63  ;;  %v658_v3 = vpop.f32.mrb[2].mxu1 }
 0x1f9   :  { %v659_v4 = vpop.f32.mrb[3].mxu1 }
 0x1fa   :  { %v374_v5 = vadd.f32 %v657_v2, %v607_v0 }
 0x1fc   :  { %v379_v6 = vmax.f32 %v374_v5, 0.0 }
 0x1fe   :  { %v380_v7 = vpack.c.bf16 %v379_v6, %v379_v6 }
 0x200   :  { %692 = vmatmul.mubr.bf16.vlgmr.msra.gmra.mrb[4].mxu0 %v380_v7 }
 0x2d3   :  { %v484_v11 = vpop.f32.mrb[4].mxu0 }
 0x2d4   :  { %v485_v12 = vadd.f32 %v624_v10, %v484_v11  ;;  %v693_v13 = vpop.f32.mrb[5].mxu0 }
 0x2d5   :  { %v487_v14 = vpop.f32.mrb[6].mxu0 }
 0x2d6   :  { %v490_v15 = vmax.f32 %v485_v12, 0.0  ;;  %v694_v16 = vpop.f32.mrb[7].mxu0 }
 0x2d8   :  { %v491_v17 = vpack.c.bf16 %v490_v15, %v490_v15 }
 0x2da   :  { %704 = vmatmul.mubr.msk.bf16.vlgmr.msra.gmra.mrb[4].mxu1 %vm529_vm1, %v491_v17 }
 0x3ad   :  { %v567_v19 = vpop.f32.mrb[4].mxu1 }
 0x3ae   :  { %v568_v20 = vadd.f32 %v633_v18, %v567_v19  ;;  %v705_v21 = vpop.f32.mrb[5].mxu1 }
 0x3af   :  { %v570_v22 = vpop.f32.mrb[6].mxu1 }
 0x3b0   :  { %v706_v23 = vpop.f32.mrb[7].mxu1  ;;  %574 = vst.msk [vmem:[#allocation7] sm:$0x3] %vm573_vm2, %v568_v20 }
 0x3b1   :  { %822 = shalt.err (!%p819_p6)
}
 0x3b2   :  { %s823_s5 = scalar_lea.hbm %s1041_s6, 32 }
 0x3b3   :  { %p824_p7 = scmp.ne.s32.totalorder %s1041_s6, %s823_s5  ;;  %p827_p8 = scmp.lt.u32.totalorder %s823_s5, %s1041_s6 }
 0x3b5   :  { %p829_p9 = pnand %p827_p8, %p824_p7 }
 0x3b7   :  { %832 = shalt.err (!%p829_p9)
}
 0x3b8   :  { %584 = dma.vmem_to_hbm [thread:$0]  %s582_s4, 32, %s1041_s6, [#allocation4]  }
 0x3b9   :  { %837 = dma.done.wait [#allocation4], 32  }
 0x3ba   :  { %838 = vsyncadd [#allocation4], 4294967264 }
 0x3bb   :  { %588 = vsyncpa [#allocation3], 1 }
 0x3bc   :  { %589 = vsyncpa [#allocation6], 1 }
 0x3bd   :  { %590 = vsyncpa [#allocation4], 1 }

</bundles_post_ra>
